<compile_context>
chip_gen: v7x
topology: tpu7x:2x2x1
jax: 0.10.0
libtpu: 0.0.40
codegen_flags: <defaults>
</compile_context>

<pallas_src>
import functools

import jax
import jax.numpy as jnp
from jax.experimental import pallas as pl
from jax.experimental.pallas import tpu as pltpu


def _round_up(x, m):
    return ((x + m - 1) // m) * m


def _conv_tile(x_ref, w_ref, l_out, k_size, stride):
    """f32 conv activations for one batch tile, channels-first.

    x_ref: (1, C_in, L_pad)      bf16
    w_ref: (K, C_out_pad, C_in)  bf16
    returns (C_out_pad, l_out)   f32
    """
    acc = None
    for k in range(k_size):                      # K is small & static -> unrolled
        if stride == 1:
            xk = x_ref[0, :, pl.ds(k, l_out)]            # (C_in, l_out)
        else:
            xk = x_ref[0, :, pl.ds(k, l_out, stride)]
        part = jnp.dot(w_ref[k], xk, preferred_element_type=jnp.float32)
        acc = part if acc is None else acc + part
    return acc


def _conv_stats_kernel(x_ref, w_ref, stats_ref, *, l_out, k_size, stride):
    """Per-tile centered BN partial stats: [:, 0] = sum, [:, 1] = M2 (centered)."""
    acc = _conv_tile(x_ref, w_ref, l_out, k_size, stride)   # (C_pad, l_out) f32
    s = jnp.sum(acc, axis=1, keepdims=True)                  # (C_pad, 1)
    mu = s * (1.0 / l_out)
    d = acc - mu
    m2 = jnp.sum(d * d, axis=1, keepdims=True)               # (C_pad, 1)
    stats_ref[0] = jnp.concatenate([s, m2], axis=1)          # (C_pad, 2)


def _conv_bn_relu_kernel(x_ref, w_ref, scale_ref, shift_ref, o_ref, *,
                         l_out, k_size, stride):
    """Recompute conv tile, fused folded-BN (FMA) + ReLU, direct NCL store."""
    acc = _conv_tile(x_ref, w_ref, l_out, k_size, stride)    # (C_pad, l_out) f32
    y = jnp.maximum(acc * scale_ref[...] + shift_ref[...], 0.0)
    c_out = o_ref.shape[1]
    o_ref[0] = y[:c_out, :].astype(o_ref.dtype)


def conv_block_forward(x_ncl, weight, bias, gamma, beta, stride, eps=1e-5):
    """Forward of ConvBlock. x_ncl: (N, C_in, L), weight: (C_out, C_in, K)."""
    del bias  # conv bias cancels exactly under train-mode BatchNorm (forward output)
    N, C_in, L = x_ncl.shape
    C_out, _, K = weight.shape
    dilation = 1
    f32 = jnp.float32

    # TF-"same" padding, exactly as conv1d_same_padding (odd pad -> one extra right).
    padding = (L - 1) * stride - L + dilation * (K - 1) + 1
    pad_l = padding // 2
    pad_r = padding // 2 + (padding % 2)
    L_pad = L + pad_l + pad_r
    L_out = (L_pad - dilation * (K - 1) - 1) // stride + 1

    C_out_pad = _round_up(C_out, 128)

    # bf16 MXU operands (accumulation stays f32 inside the kernels).
    x_b = jnp.pad(x_ncl, ((0, 0), (0, 0), (pad_l, pad_r))).astype(jnp.bfloat16)
    # weight (C_out, C_in, K) -> (K, C_out_pad, C_in); padded rows are zero.
    w_b = jnp.pad(jnp.transpose(weight, (2, 0, 1)),
                  ((0, 0), (0, C_out_pad - C_out), (0, 0))).astype(jnp.bfloat16)

    cparams = pltpu.CompilerParams(
        dimension_semantics=("parallel",),
        vmem_limit_bytes=32 * 1024 * 1024,   # far below v7x's 64 MiB physical VMEM
    )

    x_spec = pl.BlockSpec((1, C_in, L_pad), lambda n: (n, 0, 0))
    w_spec = pl.BlockSpec((K, C_out_pad, C_in), lambda n: (0, 0, 0))  # resident

    conv_flops = 2 * N * L_out * C_out_pad * C_in * K
    x_bytes = x_b.size * 2
    w_bytes = w_b.size * 2

    # --- Pass 1: per-tile centered BN partial statistics (no conv writeback). ----
    stats = pl.pallas_call(
        functools.partial(_conv_stats_kernel, l_out=L_out, k_size=K, stride=stride),
        grid=(N,),
        in_specs=[x_spec, w_spec],
        out_specs=pl.BlockSpec((1, C_out_pad, 2), lambda n: (n, 0, 0)),
        out_shape=jax.ShapeDtypeStruct((N, C_out_pad, 2), f32),
        compiler_params=cparams,
        cost_estimate=pl.CostEstimate(
            flops=conv_flops + 4 * N * L_out * C_out_pad,
            transcendentals=0,
            bytes_accessed=x_bytes + w_bytes + N * C_out_pad * 2 * 4),
    )(x_b, w_b)

    # --- Global BN stats (Chan combine of centered partials) -> scale/shift. ----
    count = N * L_out
    sum_t = stats[:, :, 0]                        # (N, C_out_pad)
    m2_t = stats[:, :, 1]                         # (N, C_out_pad)
    mean = jnp.sum(sum_t, axis=0) / count         # (C_out_pad,)
    mu_t = sum_t / L_out
    var = (jnp.sum(m2_t, axis=0)
           + L_out * jnp.sum((mu_t - mean[None, :]) ** 2, axis=0)) / count
    var = jnp.maximum(var, 0.0)                   # biased variance (train-mode BN)
    gamma_p = jnp.pad(gamma.astype(f32), (0, C_out_pad - C_out))
    beta_p = jnp.pad(beta.astype(f32), (0, C_out_pad - C_out))
    scale = gamma_p * jax.lax.rsqrt(var + eps)
    shift = beta_p - mean * scale
    scale2 = scale.reshape(C_out_pad, 1)
    shift2 = shift.reshape(C_out_pad, 1)

    # --- Pass 2: recompute conv + fused scale/shift + ReLU, direct NCL output. ---
    out = pl.pallas_call(
        functools.partial(_conv_bn_relu_kernel, l_out=L_out, k_size=K,
                          stride=stride),
        grid=(N,),
        in_specs=[
            x_spec,
            w_spec,
            pl.BlockSpec((C_out_pad, 1), lambda n: (0, 0)),
            pl.BlockSpec((C_out_pad, 1), lambda n: (0, 0)),
        ],
        out_specs=pl.BlockSpec((1, C_out, L_out), lambda n: (n, 0, 0)),
        out_shape=jax.ShapeDtypeStruct((N, C_out, L_out), x_ncl.dtype),
        compiler_params=cparams,
        cost_estimate=pl.CostEstimate(
            flops=conv_flops + 3 * N * L_out * C_out_pad,
            transcendentals=0,
            bytes_accessed=(x_bytes + w_bytes + 2 * C_out_pad * 4
                            + N * C_out * L_out * x_ncl.dtype.itemsize)),
    )(x_b, w_b, scale2, shift2)

    return out                                    # (N, C_out, L_out), NCL layout


def _reference(x, weight, bias, gamma, beta, stride, eps=1e-5):
    """Pure-JAX f32 reference of ConvBlock.forward (train-mode BN, with bias)."""
    N, C_in, L = x.shape
    C_out, _, K = weight.shape
    padding = (L - 1) * stride - L + (K - 1) + 1
    pad_l = padding // 2
    pad_r = padding // 2 + (padding % 2)
    y = jax.lax.conv_general_dilated(
        x, weight, window_strides=(stride,), padding=[(pad_l, pad_r)],
        dimension_numbers=("NCH", "OIH", "NCH"))
    y = y + bias.reshape(1, C_out, 1)
    mean = jnp.mean(y, axis=(0, 2), keepdims=True)
    var = jnp.mean((y - mean) ** 2, axis=(0, 2), keepdims=True)
    y = (y - mean) * jax.lax.rsqrt(var + eps)
    y = y * gamma.reshape(1, C_out, 1) + beta.reshape(1, C_out, 1)
    return jnp.maximum(y, 0.0)


if __name__ == "__main__":
    # ConvBlock(in_channels=4, out_channels=8, kernel_size=3, stride=1)
    N, C_in, L = 2, 4, 16
    C_out, K, stride = 8, 3, 1

    key = jax.random.PRNGKey(0)
    kx, kw, kb, kg, kbt = jax.random.split(key, 5)
    x = jax.random.normal(kx, (N, C_in, L), jnp.float32)
    weight = 0.1 * jax.random.normal(kw, (C_out, C_in, K), jnp.float32)
    bias = 0.1 * jax.random.normal(kb, (C_out,), jnp.float32)
    # non-trivial affine params to exercise the folded BN scale/shift path
    gamma = 1.0 + 0.1 * jax.random.normal(kg, (C_out,), jnp.float32)
    beta = 0.1 * jax.random.normal(kbt, (C_out,), jnp.float32)

    out = conv_block_forward(x, weight, bias, gamma, beta, stride)
    out = jax.block_until_ready(out)

    ref = _reference(x, weight, bias, gamma, beta, stride)
    assert out.shape == ref.shape == (N, C_out, L)
    # Tolerance reflects bf16 MXU operands (f32 accumulation); reference is pure f32.
    assert jnp.allclose(out, ref, atol=3e-2, rtol=3e-2), "mismatch vs reference"

    # TODO(synk): BatchNorm1d running_mean/running_var buffer updates (training
    # side effect, not part of the forward output) are not modeled.
    print("KERNEL_OK")
</pallas_src>

<mosaic_0001>
module attributes {stable_mosaic.version = 11 : i64} {
  func.func @_conv_stats_kernel(%arg0: i32, %arg1: memref<1x4x18xbf16, #tpu.memory_space<vmem>>, %arg2: memref<3x128x4xbf16, #tpu.memory_space<vmem>>, %arg3: memref<1x128x2xf32, #tpu.memory_space<vmem>>) attributes {dimension_semantics = [#tpu.dimension_semantics<parallel>], iteration_bounds = array<i64: 2>, scalar_prefetch = 0 : i64, scratch_operands = 0 : i64, tpu.core_type = #tpu.core_type<tc>, window_params = [{transform_indices = @transform_0, window_bounds = array<i64: 1, 4, 18>}, {pipeline_mode = #tpu.pipeline_mode<synchronous>, transform_indices = @transform_1, window_bounds = array<i64: 3, 128, 4>}, {transform_indices = @transform_2, window_bounds = array<i64: 1, 128, 2>}]} {
    %c0 = arith.constant 0 : index
    %c0_0 = arith.constant 0 : index
    %c0_1 = arith.constant 0 : index
    %0 = vector.load %arg1[%c0, %c0_0, %c0_1] : memref<1x4x18xbf16, #tpu.memory_space<vmem>>, vector<1x4x16xbf16>
    %1 = vector.shape_cast %0 : vector<1x4x16xbf16> to vector<4x16xbf16>
    %c0_2 = arith.constant 0 : index
    %c0_3 = arith.constant 0 : index
    %c0_4 = arith.constant 0 : index
    %2 = vector.load %arg2[%c0_2, %c0_3, %c0_4] : memref<3x128x4xbf16, #tpu.memory_space<vmem>>, vector<1x128x4xbf16>
    %3 = vector.shape_cast %2 : vector<1x128x4xbf16> to vector<128x4xbf16>
    %cst = arith.constant dense<0.000000e+00> : vector<128x16xf32>
    %4 = tpu.matmul %3, %1, %cst {dimension_numbers = #tpu.dot_dimension_numbers<[1], [0], [0], [1], [0, 0, 1, 1], [], []>} : vector<128x4xbf16>, vector<4x16xbf16>, vector<128x16xf32> -> vector<128x16xf32>
    %c0_5 = arith.constant 0 : index
    %c0_6 = arith.constant 0 : index
    %c1 = arith.constant 1 : index
    %5 = vector.load %arg1[%c0_5, %c0_6, %c1] : memref<1x4x18xbf16, #tpu.memory_space<vmem>>, vector<1x4x16xbf16>
    %6 = vector.shape_cast %5 : vector<1x4x16xbf16> to vector<4x16xbf16>
    %c1_7 = arith.constant 1 : index
    %c0_8 = arith.constant 0 : index
    %c0_9 = arith.constant 0 : index
    %7 = vector.load %arg2[%c1_7, %c0_8, %c0_9] : memref<3x128x4xbf16, #tpu.memory_space<vmem>>, vector<1x128x4xbf16>
    %8 = vector.shape_cast %7 : vector<1x128x4xbf16> to vector<128x4xbf16>
    %cst_10 = arith.constant dense<0.000000e+00> : vector<128x16xf32>
    %9 = tpu.matmul %8, %6, %cst_10 {dimension_numbers = #tpu.dot_dimension_numbers<[1], [0], [0], [1], [0, 0, 1, 1], [], []>} : vector<128x4xbf16>, vector<4x16xbf16>, vector<128x16xf32> -> vector<128x16xf32>
    %10 = arith.addf %4, %9 : vector<128x16xf32>
    %c0_11 = arith.constant 0 : index
    %c0_12 = arith.constant 0 : index
    %c2 = arith.constant 2 : index
    %11 = vector.load %arg1[%c0_11, %c0_12, %c2] : memref<1x4x18xbf16, #tpu.memory_space<vmem>>, vector<1x4x16xbf16>
    %12 = vector.shape_cast %11 : vector<1x4x16xbf16> to vector<4x16xbf16>
    %c2_13 = arith.constant 2 : index
    %c0_14 = arith.constant 0 : index
    %c0_15 = arith.constant 0 : index
    %13 = vector.load %arg2[%c2_13, %c0_14, %c0_15] : memref<3x128x4xbf16, #tpu.memory_space<vmem>>, vector<1x128x4xbf16>
    %14 = vector.shape_cast %13 : vector<1x128x4xbf16> to vector<128x4xbf16>
    %cst_16 = arith.constant dense<0.000000e+00> : vector<128x16xf32>
    %15 = tpu.matmul %14, %12, %cst_16 {dimension_numbers = #tpu.dot_dimension_numbers<[1], [0], [0], [1], [0, 0, 1, 1], [], []>} : vector<128x4xbf16>, vector<4x16xbf16>, vector<128x16xf32> -> vector<128x16xf32>
    %16 = arith.addf %10, %15 : vector<128x16xf32>
    %cst_17 = arith.constant dense<0.000000e+00> : vector<128xf32>
    %17 = vector.multi_reduction <add>, %16, %cst_17 [1] : vector<128x16xf32> to vector<128xf32>
    %18 = vector.shape_cast %17 : vector<128xf32> to vector<128x1xf32>
    %cst_18 = arith.constant 6.250000e-02 : f32
    %19 = vector.broadcast %cst_18 : f32 to vector<128x1xf32>
    %20 = arith.mulf %18, %19 : vector<128x1xf32>
    %21 = vector.broadcast %20 : vector<128x1xf32> to vector<128x16xf32>
    %22 = arith.subf %16, %21 : vector<128x16xf32>
    %23 = arith.mulf %22, %22 : vector<128x16xf32>
    %cst_19 = arith.constant dense<0.000000e+00> : vector<128xf32>
    %24 = vector.multi_reduction <add>, %23, %cst_19 [1] : vector<128x16xf32> to vector<128xf32>
    %25 = vector.shape_cast %24 : vector<128xf32> to vector<128x1xf32>
    %26 = tpu.concatenate %18, %25 in 1 : vector<128x1xf32>, vector<128x1xf32> -> vector<128x2xf32>
    %c0_20 = arith.constant 0 : index
    %c0_21 = arith.constant 0 : index
    %c0_22 = arith.constant 0 : index
    %27 = vector.load %arg3[%c0_20, %c0_21, %c0_22] : memref<1x128x2xf32, #tpu.memory_space<vmem>>, vector<1x128x2xf32>
    %28 = vector.shape_cast %27 : vector<1x128x2xf32> to vector<128x2xf32>
    %29 = vector.shape_cast %26 : vector<128x2xf32> to vector<1x128x2xf32>
    tpu.vector_store %arg3[%c0_20, %c0_21, %c0_22], %29 {strides = array<i32>} : memref<1x128x2xf32, #tpu.memory_space<vmem>>, vector<1x128x2xf32>,
    return
  }
  func.func @transform_0(%arg0: i32) -> (i32, i32, i32) {
    %c0_i32 = arith.constant 0 : i32
    %c0_i32_0 = arith.constant 0 : i32
    %c0_i32_1 = arith.constant 0 : i32
    return %arg0, %c0_i32, %c0_i32_0 : i32, i32, i32
  }
  func.func @transform_1(%arg0: i32) -> (i32, i32, i32) {
    %c0_i32 = arith.constant 0 : i32
    %c0_i32_0 = arith.constant 0 : i32
    %c0_i32_1 = arith.constant 0 : i32
    %c0_i32_2 = arith.constant 0 : i32
    return %c0_i32, %c0_i32_0, %c0_i32_1 : i32, i32, i32
  }
  func.func @transform_2(%arg0: i32) -> (i32, i32, i32) {
    %c0_i32 = arith.constant 0 : i32
    %c0_i32_0 = arith.constant 0 : i32
    %c0_i32_1 = arith.constant 0 : i32
    return %arg0, %c0_i32, %c0_i32_0 : i32, i32, i32
  }
}

</mosaic_0001>

<bundles_post_ra>
// kernel: tpu_custom_call.1
= control target key start
LH: loop header
LB: loop body
LE: loop exit
PB: predicated region body
PF: predicated region fallthrough
CT: control target
= control target key end

     0   :  { %s1230_s9 = smov 0   ;;  %s1564_s0 = inlined_call_operand.vmem [shape: bf16[2,4,18], index: 0, kind: input, shape index: {}]   ;;  %s1565_s1 = inlined_call_operand.vmem [shape: bf16[3,128,4], index: 1, kind: input, shape index: {}]   ;;  %s1566_s2 = inlined_call_operand.vmem [shape: f32[2,128,2], index: 2, kind: output, shape index: {}]  }
   0x1 LB: > { %s958_s10 = sadd.s32 4294967295, %s1210_s9   ;;  %p962_p0 = scmp.ge.s32.totalorder %s1210_s9, 1  ;;  %s1210_s9 = sphi %s1230_s9, %s12_s9  }
   0x2   : > { %p111_p1 = scmp.lt.s32.totalorder %s1210_s9, 3 }
   0x4   : > { %p112_p2 = pnand %p962_p0, %p111_p1 }
   0x5   : > { %p132_p3 = scmp.lt.s32.totalorder (!%p112_p2), %s958_s10, 1  ;;  %v220_v0 = vlaneseq (!%p112_p2)  ;;  %vm226_vm0 = vcmask (!%p112_p2), 31744   ;;  %v1212_v1 = vmov (!%p112_p2), 1983009808   ;;  %v1180_v3 = vld [vmem:[%s1565_s1] sm:$0xff] (!%p112_p2)   ;;  %vm251_vm1 = vcmask (!%p112_p2), 1041408  }
   0x6   : > { %115 = sbr.rel (%p112_p2) target bundleno = 695 (0x2b7), region = 28  ;;  %v218_v2 = vunpack.c.l.s4 (!%p112_p2), %v1212_v1  ;;  %1097 = vmatprep.mubr.msk.bf16.mxu0 (!%p112_p2), %vm226_vm0, %v1180_v3  ;;  %v1181_v8 = vld [vmem:[%s1565_s1 + $0x8] sm:$0xff] (!%p112_p2)   ;;  %v1184_v11 = vld [vmem:[%s1565_s1 + $0x40] sm:$0xff] (!%p112_p2)   ;;  %v1182_v13 = vld [vmem:[%s1565_s1 + $0x10] sm:$0xff] (!%p112_p2)   ;;  %s1213_s23 = smov (!%p112_p2), 127   ;;  %vm724_vm2 = vcmask (!%p112_p2), 130048  }
   0x7   : > { %v221_v4 = vshrl.u32 (!%p112_p2), %v220_v0, 7  ;;  %1079 = vmatprep.mubr.msk.bf16.mxu1 (!%p112_p2), %vm226_vm0, %v1184_v11  ;;  %s1214_s24 = smov (!%p112_p2), 126   ;;  %v1183_v14 = vld [vmem:[%s1565_s1 + $0x18] sm:$0xff] (!%p112_p2)   ;;  %v1186_v15 = vld [vmem:[%s1565_s1 + $0x80] sm:$0xff] (!%p112_p2)   ;;  %v1185_v18 = vld [vmem:[%s1565_s1 + $0x48] sm:$0xff] (!%p112_p2)   ;;  %vm869_vm3 = vcmask (!%p112_p2), 7168  }
   0x8   : > { %v219_v5 = vunpack.c.0.s8 (!%p112_p2), %v218_v2  ;;  %v1188_v19 = vld [vmem:[%s1565_s1 + $0x50] sm:$0xff] (!%p112_p2)   ;;  %v1187_v22 = vld [vmem:[%s1565_s1 + $0x88] sm:$0xff] (!%p112_p2)   ;;  %v1189_v24 = vld [vmem:[%s1565_s1 + $0x58] sm:$0xff] (!%p112_p2)   ;;  %vm886_vm4 = vcmask (!%p112_p2), 15360  }
   0x9   : > { %v1190_v23 = vld [vmem:[%s1565_s1 + $0x90] sm:$0xff] (!%p112_p2)   ;;  %v1192_v25 = vld [vmem:[%s1565_s1 + $0x60] sm:$0xff] (!%p112_p2)   ;;  %v1191_v26 = vld [vmem:[%s1565_s1 + $0x98] sm:$0xff] (!%p112_p2)  }
   0xa   : > { %v222_v6 = vsub.s32 (!%p112_p2), %v219_v5, %v221_v4  ;;  %v1197_v27 = vld [vmem:[%s1565_s1 + $0xa0] sm:$0xff] (!%p112_p2)   ;;  %v1193_v28 = vld [vmem:[%s1565_s1 + $0x68] sm:$0xff] (!%p112_p2)   ;;  %v1194_v29 = vld [vmem:[%s1565_s1 + $0x70] sm:$0xff] (!%p112_p2)  }
   0xb   : > { %v1199_v30 = vld [vmem:[%s1565_s1 + $0xa8] sm:$0xff] (!%p112_p2)   ;;  %v1201_v31 = vld [vmem:[%s1565_s1 + $0xb0] sm:$0xff] (!%p112_p2)   ;;  %v1195_v32 = vld [vmem:[%s1565_s1 + $0x78] sm:$0xff] (!%p112_p2)  }
   0xc   : > { %v1196_v33 = vld [vmem:[%s1565_s1 + $0x20] sm:$0xff] (!%p112_p2)   ;;  %v1203_v34 = vld [vmem:[%s1565_s1 + $0xb8] sm:$0xff] (!%p112_p2)   ;;  %v1198_v35 = vld [vmem:[%s1565_s1 + $0x28] sm:$0xff] (!%p112_p2)  }
   0xd   : > { %s1568_s10 = smov (!%p132_p3, %s958_s10), 1  ;;  %v1200_v36 = vld [vmem:[%s1565_s1 + $0x30] sm:$0xff]   ;;  %v1202_v37 = vld [vmem:[%s1565_s1 + $0x38] sm:$0xff]  }
   0xe   : > { %s963_s13 = sshll.u32 %s1568_s10, 1 }
   0xf   : > { %s135_s16 = scalar_lea.vmem %s1564_s0, %s963_s13  ;;  %s1049_s13 = sshll.u32 %s1568_s10, 7 }
  0x10   : > { %v142_v7 = vld [vmem:[%s135_s16] sm:$0x3] }
  0x11   : > { %v223_v9 = vrot.slane %v142_v7, %v222_v6  ;;  %1166 = vmatprep.subr.msk.bf16.mxu0 %vm251_vm1, %v142_v7  ;;  %v417_v10 = vsel %vm251_vm1, %v142_v7, 0  ;;  %v1038_v12 = vld.sshfl [vmem:[%s135_s16] sm:$0x3 pattern:$0x76325410]  ;;  %s1495_s16 = scalar_lea.vmem %s1566_s2, %s1049_s13 }
  0x12   : > { %1096 = vmatpush3.bf16.msra.mxu0 %v417_v10 }
  0x13   : > { %224 = vrot.lane.b32.xlu0 %v223_v9, %s1213_s23 }
  0x15   : > { %1098 = vmatmul.mubr.msk.bf16.vlgmr.msra.gmra.mrb[0].mxu0 %vm226_vm0, %v1181_v8 }
  0x16   : > { %1101 = vmatprep.mubr.msk.bf16.mxu0 %vm226_vm0, %v1182_v13 }
  0x17   : > { %582 = vrot.lane.b32.xlu0 %v1038_v12, %s1214_s24 }
  0x1d   : > { %1102 = vmatmul.mubr.msk.bf16.gmra.mrb[4].mxu0 %vm226_vm0, %v1183_v14 }
  0x1e   : > { %1115 = vmatprep.mubr.msk.bf16.mxu0 %vm226_vm0, %v1186_v15 }
  0x85   : > { %v225_v16 = vpop.permute.xlu0 %224 }
  0x86   : > { %1165 = vmatprep.subr.msk.bf16.mxu1 %vm251_vm1, %v225_v16  ;;  %v253_v17 = vsel %vm251_vm1, %v225_v16, 0 }
  0x87   : > { %1078 = vmatpush3.bf16.msra.mxu1 %v253_v17 }
  0x88   : > { %1167 = vmatprep.subr.msk.bf16.mxu1 %vm251_vm1, %v142_v7 }
  0x89   : > { %v583_v20 = vpop.permute.xlu0 %582 }
  0x8a   : > { %v609_v21 = vsel %vm251_vm1, %v583_v20, 0  ;;  %1080 = vmatmul.mubr.msk.bf16.vlgmr.msra.gmra.mrb[0].mxu1 %vm226_vm0, %v1185_v18  ;;  %1168 = vmatprep.subr.msk.bf16.mxu0 %vm251_vm1, %v583_v20 }
  0x8b   : > { %1114 = vmatpush3.bf16.msra.mxu0 %v609_v21  ;;  %1083 = vmatprep.mubr.msk.bf16.mxu1 %vm226_vm0, %v1188_v19 }
  0x8c   : > { %1132 = vmatpush3.bf16.msra.mxu1 %v417_v10 }
  0x8e   : > { %1116 = vmatmul.mubr.msk.bf16.vlgmr.msra.gmra.mrb[0].mxu0 %vm226_vm0, %v1187_v22 }
  0x8f   : > { %1119 = vmatprep.mubr.msk.bf16.mxu0 %vm226_vm0, %v1190_v23 }
  0x92   : > { %1084 = vmatmul.mubr.msk.bf16.gmra.mrb[4].mxu1 %vm226_vm0, %v1189_v24 }
  0x93   : > { %1087 = vmatprep.mubr.msk.bf16.mxu1 %vm226_vm0, %v1192_v25 }
  0x96   : > { %1120 = vmatmul.mubr.msk.bf16.gmra.mrb[4].mxu0 %vm226_vm0, %v1191_v26 }
  0x97   : > { %1123 = vmatprep.mubr.msk.bf16.mxu0 %vm226_vm0, %v1197_v27 }
  0x9a   : > { %1088 = vmatmul.mubr.msk.bf16.gmra.mrb[8].mxu1 %vm226_vm0, %v1193_v28 }
  0x9b   : > { %1091 = vmatprep.mubr.msk.bf16.mxu1 %vm226_vm0, %v1194_v29 }
  0x9e   : > { %1124 = vmatmul.mubr.msk.bf16.gmra.mrb[8].mxu0 %vm226_vm0, %v1199_v30 }
  0x9f   : > { %1127 = vmatprep.mubr.msk.bf16.mxu0 %vm226_vm0, %v1201_v31 }
  0xa2   : > { %1092 = vmatmul.mubr.msk.bf16.gmra.mrb[12].mxu1 %vm226_vm0, %v1195_v32 }
  0xa3   : > { %1105 = vmatprep.mubr.msk.bf16.mxu1 %vm226_vm0, %v1196_v33 }
  0xa6   : > { %1128 = vmatmul.mubr.msk.bf16.gmra.mrb[12].mxu0 %vm226_vm0, %v1203_v34 }
  0xaa   : > { %1106 = vmatmul.mubr.msk.bf16.vlgmr.msra.gmra.mrb[8].mxu1 %vm226_vm0, %v1198_v35 }
  0xab   : > { %1109 = vmatprep.mubr.msk.bf16.mxu1 %vm226_vm0, %v1200_v36 }
  0xb2   : > { %1110 = vmatmul.mubr.msk.bf16.gmra.mrb[12].mxu1 %vm226_vm0, %v1202_v37 }
 0x15d   : > { %v1081_v38 = vpop.f32.mrb[0].mxu1 }
 0x15e   : > { %v289_v39 = vpop.f32.mrb[1].mxu1 }
 0x15f   : > { %v1082_v40 = vpop.f32.mrb[2].mxu1 }
 0x160   : > { %v292_v41 = vpop.f32.mrb[3].mxu1 }
 0x161   : > { %v1117_v42 = vpop.f32.mrb[0].mxu0 }
 0x162   : > { %v1347_v43 = vadd.f32 %v1117_v42, %v1081_v38  ;;  %v645_v44 = vpop.f32.mrb[1].mxu0 }
 0x163   : > { %v1349_v45 = vadd.f32 %v645_v44, %v289_v39  ;;  %v1118_v46 = vpop.f32.mrb[2].mxu0 }
 0x164   : > { %v1351_v47 = vadd.f32 %v1118_v46, %v1082_v40  ;;  %v648_v48 = vpop.f32.mrb[3].mxu0  ;;  %v731_v49 = vsel %vm724_vm2, %v1347_v43, 0.0 }
 0x165   : > { %v1355_v50 = vadd.f32 %v648_v48, %v292_v41  ;;  %732 = vadd.xlane.f32.xlu0 %v731_v49  ;;  %v725_v51 = vsel %vm724_vm2, %v1349_v45, 0.0  ;;  %v1085_v52 = vpop.f32.mrb[4].mxu1 }
 0x166   : > { %726 = vadd.xlane.f32.xlu1 %v725_v51  ;;  %v305_v53 = vpop.f32.mrb[5].mxu1  ;;  %v734_v57 = vsel %vm724_vm2, %v1351_v47, 0.0 }
 0x167   : > { %v1086_v54 = vpop.f32.mrb[6].mxu1  ;;  %v728_v1 = vsel %vm724_vm2, %v1355_v50, 0.0 }
 0x168   : > { %v308_v55 = vpop.f32.mrb[7].mxu1 }
 0x169   : > { %v1121_v56 = vpop.f32.mrb[4].mxu0 }
 0x16a   : > { %v1361_v58 = vadd.f32 %v1121_v56, %v1085_v52  ;;  %735 = vadd.xlane.f32.xlu1 %v734_v57  ;;  %v661_v59 = vpop.f32.mrb[5].mxu0 }
 0x16b   : > { %v1363_v60 = vadd.f32 %v661_v59, %v305_v53  ;;  %v1122_v61 = vpop.f32.mrb[6].mxu0 }
 0x16c   : > { %v1365_v62 = vadd.f32 %v1122_v61, %v1086_v54  ;;  %v664_v63 = vpop.f32.mrb[7].mxu0  ;;  %v743_v2 = vsel %vm724_vm2, %v1361_v58, 0.0 }
 0x16d   : > { %v1367_v0 = vadd.f32 %v664_v63, %v308_v55  ;;  %v737_v7 = vsel %vm724_vm2, %v1363_v60, 0.0 }
 0x16e   : > { %729 = vadd.xlane.f32.xlu1 %v728_v1  ;;  %v746_v8 = vsel %vm724_vm2, %v1365_v62, 0.0 }
 0x16f   : > { %v740_v14 = vsel %vm724_vm2, %v1367_v0, 0.0 }
 0x171   : > { %v1125_v3 = vpop.f32.mrb[8].mxu0 }
 0x172   : > { %744 = vadd.xlane.f32.xlu1 %v743_v2  ;;  %v677_v4 = vpop.f32.mrb[9].mxu0 }
 0x173   : > { %v1126_v5 = vpop.f32.mrb[10].mxu0 }
 0x174   : > { %v680_v6 = vpop.f32.mrb[11].mxu0 }
 0x176   : > { %738 = vadd.xlane.f32.xlu1 %v737_v7 }
 0x179   : > { %v1129_v9 = vpop.f32.mrb[12].mxu0 }
 0x17a   : > { %747 = vadd.xlane.f32.xlu1 %v746_v8  ;;  %v693_v10 = vpop.f32.mrb[13].mxu0 }
 0x17b   : > { %v1130_v11 = vpop.f32.mrb[14].mxu0 }
 0x17c   : > { %v696_v12 = vpop.f32.mrb[15].mxu0 }
 0x17d   : > { %v1107_v13 = vpop.f32.mrb[8].mxu1 }
 0x17e   : > { %v1379_v15 = vadd.f32 %v1125_v3, %v1107_v13  ;;  %v485_v16 = vpop.f32.mrb[9].mxu1  ;;  %741 = vadd.xlane.f32.xlu1 %v740_v14 }
 0x17f   : > { %v1381_v17 = vadd.f32 %v677_v4, %v485_v16  ;;  %v1108_v18 = vpop.f32.mrb[10].mxu1 }
 0x180   : > { %v1383_v19 = vadd.f32 %v1126_v5, %v1108_v18  ;;  %v488_v20 = vpop.f32.mrb[11].mxu1  ;;  %v755_v21 = vsel %vm724_vm2, %v1379_v15, 0.0 }
 0x181   : > { %v1387_v22 = vadd.f32 %v680_v6, %v488_v20  ;;  %v749_v25 = vsel %vm724_vm2, %v1381_v17, 0.0 }
 0x182   : > { %756 = vadd.xlane.f32.xlu1 %v755_v21  ;;  %v758_v23 = vsel %vm724_vm2, %v1383_v19, 0.0 }
 0x183   : > { %759 = vadd.xlane.f32.xlu0 %v758_v23  ;;  %v752_v33 = vsel %vm724_vm2, %v1387_v22, 0.0 }
 0x185   : > { %v1111_v24 = vpop.f32.mrb[12].mxu1 }
 0x186   : > { %v1393_v26 = vadd.f32 %v1129_v9, %v1111_v24  ;;  %v501_v27 = vpop.f32.mrb[13].mxu1  ;;  %750 = vadd.xlane.f32.xlu1 %v749_v25 }
 0x187   : > { %v1395_v28 = vadd.f32 %v693_v10, %v501_v27  ;;  %v1112_v29 = vpop.f32.mrb[14].mxu1 }
 0x188   : > { %v1397_v30 = vadd.f32 %v1130_v11, %v1112_v29  ;;  %v504_v31 = vpop.f32.mrb[15].mxu1  ;;  %v767_v37 = vsel %vm724_vm2, %v1393_v26, 0.0 }
 0x189   : > { %v1399_v32 = vadd.f32 %v696_v12, %v504_v31  ;;  %v761_v35 = vsel %vm724_vm2, %v1395_v28, 0.0 }
 0x18a   : > { %753 = vadd.xlane.f32.xlu1 %v752_v33  ;;  %v770_v36 = vsel %vm724_vm2, %v1397_v30, 0.0 }
 0x18b   : > { %v764_v34 = vsel %vm724_vm2, %v1399_v32, 0.0 }
 0x18c   : > { %765 = vadd.xlane.f32.xlu0 %v764_v34 }
 0x18e   : > { %762 = vadd.xlane.f32.xlu1 %v761_v35 }
 0x190   : > { %771 = vadd.xlane.f32.xlu0 %v770_v36 }
 0x192   : > { %768 = vadd.xlane.f32.xlu1 %v767_v37 }
 0x1f2   : > { %v1411_v38 = vpop.xlane.xlu0 %732 }
 0x1f3   : > { %v775_v39 = vmul.f32 0.0625, %v1411_v38  ;;  %v1414_v40 = vpop.xlane.xlu1 %726 }
 0x1f4   : > { %v773_v41 = vmul.f32 0.0625, %v1414_v40 }
 0x1f5   : > { %v791_v42 = vsub.f32 %v1347_v43, %v775_v39 }
 0x1f6   : > { %v789_v44 = vsub.f32 %v1349_v45, %v773_v41 }
 0x1f7   : > { %v1419_v46 = vpop.xlane.xlu1 %735  ;;  %v807_v48 = vmul.f32 %v791_v42, %v791_v42 }
 0x1f8   : > { %v776_v49 = vmul.f32 0.0625, %v1419_v46  ;;  %v805_v52 = vmul.f32 %v789_v44, %v789_v44 }
 0x1f9   : > { %v827_v51 = vsel %vm724_vm2, %v807_v48, 0.0 }
 0x1fa   : > { %828 = vadd.xlane.f32.xlu1 %v827_v51  ;;  %v792_v53 = vsub.f32 %v1351_v47, %v776_v49  ;;  %v821_v43 = vsel %vm724_vm2, %v805_v52, 0.0 }
 0x1fb   : > { %v1424_v54 = vpop.xlane.xlu1 %729 }
 0x1fc   : > { %v774_v55 = vmul.f32 0.0625, %v1424_v54  ;;  %v808_v56 = vmul.f32 %v792_v53, %v792_v53 }
 0x1fe   : > { %822 = vadd.xlane.f32.xlu1 %v821_v43  ;;  %v830_v45 = vsel %vm724_vm2, %v808_v56, 0.0  ;;  %v790_v57 = vsub.f32 %v1355_v50, %v774_v55 }
 0x1ff   : > { %v1430_v59 = vpop.xlane.xlu1 %744  ;;  %831 = vadd.xlane.f32.xlu0 %v830_v45 }
 0x200   : > { %v779_v61 = vmul.f32 0.0625, %v1430_v59  ;;  %v806_v63 = vmul.f32 %v790_v57, %v790_v57 }
 0x202   : > { %v824_v47 = vsel %vm724_vm2, %v806_v63, 0.0  ;;  %v795_v1 = vsub.f32 %v1361_v58, %v779_v61 }
 0x203   : > { %v1435_v2 = vpop.xlane.xlu1 %738  ;;  %825 = vadd.xlane.f32.xlu0 %v824_v47 }
 0x204   : > { %v777_v3 = vmul.f32 0.0625, %v1435_v2  ;;  %v811_v4 = vmul.f32 %v795_v1, %v795_v1 }
 0x206   : > { %v839_v5 = vsel %vm724_vm2, %v811_v4, 0.0  ;;  %v793_v50 = vsub.f32 %v1363_v60, %v777_v3 }
 0x207   : > { %v1440_v6 = vpop.xlane.xlu1 %747  ;;  %840 = vadd.xlane.f32.xlu1 %v839_v5 }
 0x208   : > { %v780_v7 = vmul.f32 0.0625, %v1440_v6  ;;  %v809_v8 = vmul.f32 %v793_v50, %v793_v50 }
 0x20a   : > { %v833_v9 = vsel %vm724_vm2, %v809_v8, 0.0  ;;  %v796_v58 = vsub.f32 %v1365_v62, %v780_v7 }
 0x20b   : > { %v1445_v10 = vpop.xlane.xlu1 %741  ;;  %834 = vadd.xlane.f32.xlu1 %v833_v9 }
 0x20c   : > { %v778_v11 = vmul.f32 0.0625, %v1445_v10  ;;  %v812_v12 = vmul.f32 %v796_v58, %v796_v58 }
 0x20e   : > { %v842_v13 = vsel %vm724_vm2, %v812_v12, 0.0  ;;  %v794_v60 = vsub.f32 %v1367_v0, %v778_v11 }
 0x20f   : > { %v1450_v14 = vpop.xlane.xlu1 %756  ;;  %843 = vadd.xlane.f32.xlu0 %v842_v13 }
 0x210   : > { %v783_v16 = vmul.f32 0.0625, %v1450_v14  ;;  %v1453_v18 = vpop.xlane.xlu0 %759  ;;  %v810_v20 = vmul.f32 %v794_v60, %v794_v60 }
 0x211   : > { %v784_v62 = vmul.f32 0.0625, %v1453_v18 }
 0x212   : > { %v836_v21 = vsel %vm724_vm2, %v810_v20, 0.0  ;;  %v799_v23 = vsub.f32 %v1379_v15, %v783_v16 }
 0x213   : > { %v1458_v24 = vpop.xlane.xlu1 %750  ;;  %837 = vadd.xlane.f32.xlu0 %v836_v21  ;;  %v800_v25 = vsub.f32 %v1383_v19, %v784_v62 }
 0x214   : > { %v781_v0 = vmul.f32 0.0625, %v1458_v24  ;;  %v815_v27 = vmul.f32 %v799_v23, %v799_v23 }
 0x215   : > { %v816_v29 = vmul.f32 %v800_v25, %v800_v25 }
 0x216   : > { %v851_v31 = vsel %vm724_vm2, %v815_v27, 0.0  ;;  %v797_v33 = vsub.f32 %v1381_v17, %v781_v0 }
 0x217   : > { %v1464_v34 = vpop.xlane.xlu1 %753  ;;  %852 = vadd.xlane.f32.xlu1 %v851_v31  ;;  %v854_v35 = vsel %vm724_vm2, %v816_v29, 0.0 }
 0x218   : > { %v782_v15 = vmul.f32 0.0625, %v1464_v34  ;;  %855 = vadd.xlane.f32.xlu0 %v854_v35  ;;  %v813_v36 = vmul.f32 %v797_v33, %v797_v33 }
 0x219   : > { %v1468_v37 = vpop.xlane.xlu0 %765 }
 0x21a   : > { %v786_v19 = vmul.f32 0.0625, %v1468_v37  ;;  %v845_v39 = vsel %vm724_vm2, %v813_v36, 0.0  ;;  %v798_v41 = vsub.f32 %v1387_v22, %v782_v15 }
 0x21b   : > { %846 = vadd.xlane.f32.xlu1 %v845_v39  ;;  %v1473_v42 = vpop.xlane.xlu1 %762 }
 0x21c   : > { %v785_v17 = vmul.f32 0.0625, %v1473_v42  ;;  %v814_v44 = vmul.f32 %v798_v41, %v798_v41  ;;  %v802_v48 = vsub.f32 %v1399_v32, %v786_v19 }
 0x21d   : > { %v1477_v49 = vpop.xlane.xlu0 %771 }
 0x21e   : > { %v788_v51 = vmul.f32 0.0625, %v1477_v49  ;;  %v848_v52 = vsel %vm724_vm2, %v814_v44, 0.0  ;;  %v801_v53 = vsub.f32 %v1395_v28, %v785_v17  ;;  %v818_v55 = vmul.f32 %v802_v48, %v802_v48 }
 0x21f   : > { %v1482_v56 = vpop.xlane.xlu1 %768  ;;  %849 = vadd.xlane.f32.xlu0 %v848_v52 }
 0x220   : > { %v787_v22 = vmul.f32 0.0625, %v1482_v56  ;;  %v817_v43 = vmul.f32 %v801_v53, %v801_v53  ;;  %v804_v45 = vsub.f32 %v1397_v30, %v788_v51  ;;  %v860_v57 = vsel %vm724_vm2, %v818_v55, 0.0 }
 0x222   : > { %v857_v32 = vsel %vm724_vm2, %v817_v43, 0.0  ;;  %v803_v61 = vsub.f32 %v1393_v26, %v787_v22  ;;  %v820_v63 = vmul.f32 %v804_v45, %v804_v45 }
 0x223   : > { %858 = vadd.xlane.f32.xlu1 %v857_v32  ;;  %861 = vadd.xlane.f32.xlu0 %v860_v57 }
 0x224   : > { %v819_v28 = vmul.f32 %v803_v61, %v803_v61  ;;  %v866_v1 = vsel %vm724_vm2, %v820_v63, 0.0 }
 0x226   : > { %v863_v47 = vsel %vm724_vm2, %v819_v28, 0.0 }
 0x227   : > { %864 = vadd.xlane.f32.xlu1 %v863_v47  ;;  %867 = vadd.xlane.f32.xlu0 %v866_v1 }
 0x287   : > { %v829_v26 = vpop.xlane.xlu1 %828 }
 0x288   : > { %v872_v30 = vsel %vm869_vm3, %v1411_v38, %v829_v26 }
 0x289   : > { %889 = vst.msk [vmem:[%s1495_s16 + $0x10] sm:$0xff] %vm886_vm4, %v872_v30 }
 0x28b   : > { %v823_v3 = vpop.xlane.xlu1 %822 }
 0x28c   : > { %v870_v4 = vsel %vm869_vm3, %v1414_v40, %v823_v3  ;;  %v832_v5 = vpop.xlane.xlu0 %831 }
 0x28d   : > { %887 = vst.msk [vmem:[%s1495_s16] sm:$0xff] %vm886_vm4, %v870_v4  ;;  %v873_v50 = vsel %vm869_vm3, %v1419_v46, %v832_v5 }
 0x28e   : > { %890 = vst.msk [vmem:[%s1495_s16 + $0x18] sm:$0xff] %vm886_vm4, %v873_v50 }
 0x290   : > { %v826_v7 = vpop.xlane.xlu0 %825 }
 0x291   : > { %v871_v38 = vsel %vm869_vm3, %v1424_v54, %v826_v7 }
 0x292   : > { %888 = vst.msk [vmem:[%s1495_s16 + $0x8] sm:$0xff] %vm886_vm4, %v871_v38 }
 0x294   : > { %v841_v8 = vpop.xlane.xlu1 %840 }
 0x295   : > { %v876_v40 = vsel %vm869_vm3, %v1430_v59, %v841_v8 }
 0x296   : > { %893 = vst.msk [vmem:[%s1495_s16 + $0x30] sm:$0xff] %vm886_vm4, %v876_v40 }
 0x298   : > { %v835_v9 = vpop.xlane.xlu1 %834 }
 0x299   : > { %v874_v46 = vsel %vm869_vm3, %v1435_v2, %v835_v9 }
 0x29a   : > { %891 = vst.msk [vmem:[%s1495_s16 + $0x20] sm:$0xff] %vm886_vm4, %v874_v46 }
 0x29c   : > { %v844_v58 = vpop.xlane.xlu0 %843 }
 0x29d   : > { %v877_v54 = vsel %vm869_vm3, %v1440_v6, %v844_v58 }
 0x29e   : > { %894 = vst.msk [vmem:[%s1495_s16 + $0x38] sm:$0xff] %vm886_vm4, %v877_v54 }
 0x2a0   : > { %v838_v11 = vpop.xlane.xlu0 %837 }
 0x2a1   : > { %v875_v59 = vsel %vm869_vm3, %v1445_v10, %v838_v11 }
 0x2a2   : > { %892 = vst.msk [vmem:[%s1495_s16 + $0x28] sm:$0xff] %vm886_vm4, %v875_v59 }
 0x2a4   : > { %v853_v12 = vpop.xlane.xlu1 %852 }
 0x2a5   : > { %v880_v2 = vsel %vm869_vm3, %v1450_v14, %v853_v12  ;;  %v856_v13 = vpop.xlane.xlu0 %855 }
 0x2a6   : > { %897 = vst.msk [vmem:[%s1495_s16 + $0x50] sm:$0xff] %vm886_vm4, %v880_v2  ;;  %v881_v6 = vsel %vm869_vm3, %v1453_v18, %v856_v13 }
 0x2a7   : > { %898 = vst.msk [vmem:[%s1495_s16 + $0x58] sm:$0xff] %vm886_vm4, %v881_v6 }
 0x2a8   : > { %v847_v60 = vpop.xlane.xlu1 %846 }
 0x2a9   : > { %v878_v10 = vsel %vm869_vm3, %v1458_v24, %v847_v60 }
 0x2aa   : > { %895 = vst.msk [vmem:[%s1495_s16 + $0x40] sm:$0xff] %vm886_vm4, %v878_v10 }
 0x2ac   : > { %v850_v16 = vpop.xlane.xlu0 %849 }
 0x2ad   : > { %v879_v14 = vsel %vm869_vm3, %v1464_v34, %v850_v16 }
 0x2ae   : > { %896 = vst.msk [vmem:[%s1495_s16 + $0x48] sm:$0xff] %vm886_vm4, %v879_v14 }
 0x2b0   : > { %v859_v20 = vpop.xlane.xlu1 %858  ;;  %v862_v62 = vpop.xlane.xlu0 %861 }
 0x2b1   : > { %v882_v18 = vsel %vm869_vm3, %v1473_v42, %v859_v20  ;;  %v883_v21 = vsel %vm869_vm3, %v1468_v37, %v862_v62 }
 0x2b2   : > { %899 = vst.msk [vmem:[%s1495_s16 + $0x60] sm:$0xff] %vm886_vm4, %v882_v18  ;;  %900 = vst.msk [vmem:[%s1495_s16 + $0x68] sm:$0xff] %vm886_vm4, %v883_v21 }
 0x2b4   : > { %v865_v23 = vpop.xlane.xlu1 %864  ;;  %v868_v24 = vpop.xlane.xlu0 %867 }
 0x2b5   : > { %v884_v25 = vsel %vm869_vm3, %v1482_v56, %v865_v23  ;;  %v885_v0 = vsel %vm869_vm3, %v1477_v49, %v868_v24 }
 0x2b6   : > { %901 = vst.msk [vmem:[%s1495_s16 + $0x70] sm:$0xff] %vm886_vm4, %v884_v25  ;;  %902 = vst.msk [vmem:[%s1495_s16 + $0x78] sm:$0xff] %vm886_vm4, %v885_v0 }
 0x2b7 PF: > { %s12_s9 = sadd.s32 1, %s1210_s9  }
 0x2b8   : > { %p9_p4 = scmp.ge.s32.totalorder %s12_s9, 4  }
 0x2ba   :  { %11 = sbr.rel (!%p9_p4) target bundleno = 1 (0x1), region = 60 }

</bundles_post_ra>
